<compile_context>
chip_gen: v7x
topology: tpu7x:2x2x1
jax: 0.10.0
libtpu: 0.0.40
codegen_flags: <defaults>
</compile_context>

<pallas_src>
import functools

import jax
import jax.numpy as jnp
from jax.experimental import pallas as pl
from jax.experimental.pallas import tpu as pltpu


# ----------------------------- helpers ---------------------------------------
def _round_up(v, m):
    return ((v + m - 1) // m) * m


def _pad2(a, rows, cols):
    r, c = a.shape
    return jnp.pad(a, ((0, rows - r), (0, cols - c)))


def _full_spec(arr):
    nd = arr.ndim
    return pl.BlockSpec(arr.shape, lambda i, _nd=nd: (0,) * _nd)


def _choose_row_tile(M):
    """Row tile (TM) and padded row count so M_pad % TM == 0 and TM % 8 == 0."""
    m8 = _round_up(max(M, 8), 8)
    if m8 <= 256:
        return m8, m8
    tm = 256
    return tm, _round_up(M, tm)


# ----------------------------- kernels ---------------------------------------
def make_shared_kernel(n_enc_layers):
    """Domain-classifier shared encoder only (mode == 'target')."""

    def kernel(*refs):
        i = 0
        x_ref = refs[i]; i += 1                               # [TM, D] bf16
        enc = refs[i:i + 2 * n_enc_layers]; i += 2 * n_enc_layers
        shared_ref = refs[i]                                  # [TM, E_pad] f32

        x = x_ref[...]                                        # bf16 operands
        h = jnp.tanh(jnp.dot(x, enc[0][...],
                             preferred_element_type=jnp.float32) + enc[1][...])
        for l in range(1, n_enc_layers):
            w = enc[2 * l][...]
            b = enc[2 * l + 1][...]
            h = jnp.tanh(jnp.dot(h.astype(jnp.bfloat16), w,
                                 preferred_element_type=jnp.float32) + b)
        shared_ref[...] = h.astype(shared_ref.dtype)

    return kernel


def make_source_kernel(n_enc_layers, n_ner_layers):
    """Shared encoder + NER head (mode == 'source')."""

    def kernel(*refs):
        i = 0
        x_ref = refs[i]; i += 1                               # [TM, D] bf16
        enc = refs[i:i + 2 * n_enc_layers]; i += 2 * n_enc_layers
        wn0x_ref, wn0s_ref, bn0_ref = refs[i:i + 3]; i += 3
        ner = refs[i:i + 2 * (n_ner_layers - 1)]; i += 2 * (n_ner_layers - 1)
        wo_ref, bo_ref = refs[i:i + 2]; i += 2
        shared_ref, logits_ref = refs[i:i + 2]                # outputs

        x = x_ref[...]                                        # bf16 [TM, D]

        # --- shared encoder: tanh MLP (f32 activations, bf16 dot operands) ----
        h = jnp.tanh(jnp.dot(x, enc[0][...],
                             preferred_element_type=jnp.float32) + enc[1][...])
        for l in range(1, n_enc_layers):
            w = enc[2 * l][...]
            b = enc[2 * l + 1][...]
            h = jnp.tanh(jnp.dot(h.astype(jnp.bfloat16), w,
                                 preferred_element_type=jnp.float32) + b)
        shared_ref[...] = h.astype(shared_ref.dtype)

        # --- NER head on concat(x, shared); concat fused into split matmul ----
        nh = (jnp.dot(x, wn0x_ref[...], preferred_element_type=jnp.float32)
              + jnp.dot(h.astype(jnp.bfloat16), wn0s_ref[...],
                        preferred_element_type=jnp.float32)
              + bn0_ref[...])
        nh = jnp.maximum(nh, 0.0)
        for l in range(n_ner_layers - 1):
            w = ner[2 * l][...]
            b = ner[2 * l + 1][...]
            nh = jnp.maximum(
                jnp.dot(nh.astype(jnp.bfloat16), w,
                        preferred_element_type=jnp.float32) + b, 0.0)
        logits = jnp.dot(nh.astype(jnp.bfloat16), wo_ref[...],
                         preferred_element_type=jnp.float32) + bo_ref[...]
        logits_ref[...] = logits.astype(logits_ref.dtype)

    return kernel


# ----------------------------- wrapper ----------------------------------------
@functools.partial(jax.jit,
                   static_argnames=("n_enc_layers", "n_ner_layers", "mode"))
def _overall_forward_core(x, flat_params, *, n_enc_layers, n_ner_layers, mode):
    B, S, D = x.shape
    E = flat_params[0].shape[1]
    c = 2 * n_enc_layers
    wc, bc = flat_params[c], flat_params[c + 1]
    wn0x, wn0s, bn0 = flat_params[c + 2], flat_params[c + 3], flat_params[c + 4]
    H = wn0x.shape[1]
    wo, bo = flat_params[-2], flat_params[-1]
    T = wo.shape[1]

    E_pad = _round_up(E, 128)
    H_pad = _round_up(H, 128)
    T_pad = _round_up(T, 128)

    # Fold batch into the matmul M dimension (lane-dense row tiles).
    M = B * S
    TM, M_pad = _choose_row_tile(M)
    n_tiles = M_pad // TM
    x2d = jnp.pad(x.reshape(M, D), ((0, M_pad - M), (0, 0))).astype(jnp.bfloat16)

    # Zero-pad weights to 128-multiples (exact) and cast matmul weights to bf16.
    enc_args = []
    for l in range(n_enc_layers):
        w = flat_params[2 * l]
        b = flat_params[2 * l + 1]
        rows = D if l == 0 else E_pad
        enc_args.append(_pad2(w, rows, E_pad).astype(jnp.bfloat16))
        enc_args.append(_pad2(b, 1, E_pad))                  # f32 bias

    x_spec = pl.BlockSpec((TM, D), lambda i: (i, 0))
    shared_spec = pl.BlockSpec((TM, E_pad), lambda i: (i, 0))

    bytes_x = int(x2d.size) * 2
    bytes_shared = M_pad * E_pad * 4
    flops_shared = 2 * M_pad * (D * E_pad + (n_enc_layers - 1) * E_pad * E_pad)
    trans = M_pad * E_pad * n_enc_layers

    compiler_params = pltpu.CompilerParams(
        dimension_semantics=("parallel",),
        vmem_limit_bytes=48 * 1024 * 1024)   # budget for v7x's 64 MiB VMEM

    if mode == "target":
        w_bytes = sum(int(a.size) * a.dtype.itemsize for a in enc_args)
        shared_pad = pl.pallas_call(
            make_shared_kernel(n_enc_layers),
            grid=(n_tiles,),
            in_specs=[x_spec] + [_full_spec(a) for a in enc_args],
            out_specs=shared_spec,
            out_shape=jax.ShapeDtypeStruct((M_pad, E_pad), jnp.float32),
            compiler_params=compiler_params,
            cost_estimate=pl.CostEstimate(
                flops=flops_shared, transcendentals=trans,
                bytes_accessed=bytes_x + w_bytes + bytes_shared),
        )(x2d, *enc_args)
        shared = shared_pad[:M, :E].reshape(B, S, E)
        task = jnp.mean(shared, axis=1) @ wc + bc            # tiny head in XLA
        return task, shared

    # mode == "source": shared encoder + NER branch.
    ner_args = [_pad2(wn0x, D, H_pad).astype(jnp.bfloat16),
                _pad2(wn0s, E_pad, H_pad).astype(jnp.bfloat16),
                _pad2(bn0, 1, H_pad)]
    for l in range(n_ner_layers - 1):
        w = flat_params[c + 5 + 2 * l]
        b = flat_params[c + 5 + 2 * l + 1]
        ner_args.append(_pad2(w, H_pad, H_pad).astype(jnp.bfloat16))
        ner_args.append(_pad2(b, 1, H_pad))
    ner_args.append(_pad2(wo, H_pad, T_pad).astype(jnp.bfloat16))
    ner_args.append(_pad2(bo, 1, T_pad))

    all_args = enc_args + ner_args
    w_bytes = sum(int(a.size) * a.dtype.itemsize for a in all_args)
    flops_ner = 2 * M_pad * (D * H_pad + E_pad * H_pad
                             + (n_ner_layers - 1) * H_pad * H_pad
                             + H_pad * T_pad)
    bytes_logits = M_pad * T_pad * 4

    shared_pad, logits_pad = pl.pallas_call(
        make_source_kernel(n_enc_layers, n_ner_layers),
        grid=(n_tiles,),
        in_specs=[x_spec] + [_full_spec(a) for a in all_args],
        out_specs=(shared_spec,
                   pl.BlockSpec((TM, T_pad), lambda i: (i, 0))),
        out_shape=(jax.ShapeDtypeStruct((M_pad, E_pad), jnp.float32),
                   jax.ShapeDtypeStruct((M_pad, T_pad), jnp.float32)),
        compiler_params=compiler_params,
        cost_estimate=pl.CostEstimate(
            flops=flops_shared + flops_ner, transcendentals=trans,
            bytes_accessed=bytes_x + w_bytes + bytes_shared + bytes_logits),
    )(x2d, *all_args)

    shared = shared_pad[:M, :E].reshape(B, S, E)
    task = jnp.mean(shared, axis=1) @ wc + bc                # [B, num_domains]
    encoding = logits_pad[:M, :T].reshape(B, S, T)
    return task, shared, encoding


def overall_model_forward(x, params, mode, *, n_enc_layers, n_ner_layers):
    """Mirrors OverallModel.forward(x, mode)."""
    if mode == "source":
        task, shared, enc = _overall_forward_core(
            x, tuple(params), n_enc_layers=n_enc_layers,
            n_ner_layers=n_ner_layers, mode="source")
        return task, shared, enc
    elif mode == "target":
        task, shared = _overall_forward_core(
            x, tuple(params), n_enc_layers=n_enc_layers,
            n_ner_layers=n_ner_layers, mode="target")
        return task, shared, None
    else:
        raise ValueError("Error Mode")


# ----------------------------- param init ------------------------------------
def init_params(key, bert_dim, encode_dim, n_enc_layers, num_domains,
                ner_d_hidden, n_ner_layers, ner_num_tags):
    def nxt():
        nonlocal key
        key, sub = jax.random.split(key)
        return sub

    def lin(din, dout, scale=0.1):
        w = scale * jax.random.normal(nxt(), (din, dout), jnp.float32)
        b = scale * jax.random.normal(nxt(), (1, dout), jnp.float32)
        return w, b

    flat = []
    din = bert_dim
    for _ in range(n_enc_layers):                 # domain-clf shared encoder
        w, b = lin(din, encode_dim)
        flat += [w, b]
        din = encode_dim
    wc, bc = lin(encode_dim, num_domains)         # domain classification head
    flat += [wc, bc]
    wn0x, _ = lin(bert_dim, ner_d_hidden)         # NER layer 0 on concat(x, shared)
    wn0s, bn0 = lin(encode_dim, ner_d_hidden)
    flat += [wn0x, wn0s, bn0]
    for _ in range(n_ner_layers - 1):             # NER layers 1..n-1
        w, b = lin(ner_d_hidden, ner_d_hidden)
        flat += [w, b]
    wo, bo = lin(ner_d_hidden, ner_num_tags)      # NER emission scores
    flat += [wo, bo]
    return flat


# ----------------------------- pure-JAX reference -----------------------------
def _reference_forward(x, params, mode, n_enc_layers, n_ner_layers):
    h = x
    i = 0
    for _ in range(n_enc_layers):
        w, b = params[i], params[i + 1]; i += 2
        h = jnp.tanh(h @ w + b)
    shared = h
    wc, bc = params[i], params[i + 1]; i += 2
    task = jnp.mean(shared, axis=1) @ wc + bc
    if mode == "target":
        return task, shared, None
    wn0x, wn0s, bn0 = params[i], params[i + 1], params[i + 2]; i += 3
    nh = jnp.maximum(x @ wn0x + shared @ wn0s + bn0, 0.0)
    for _ in range(n_ner_layers - 1):
        w, b = params[i], params[i + 1]; i += 2
        nh = jnp.maximum(nh @ w + b, 0.0)
    wo, bo = params[-2], params[-1]
    return task, shared, nh @ wo + bo


# ----------------------------- main -------------------------------------------
if __name__ == "__main__":
    # Small, forward-consistent shapes.
    B, S = 2, 8                 # batch, seq_len
    bert_dim = 32
    domain_clf_encode_dim = 32
    domain_clf_num_layer = 2
    num_domains = 4
    ner_d_hidden = 32
    ner_num_layers = 2
    ner_num_tags = 8
    # TODO(synk): the pretrained `bert_type` encoder, dropout (train mode) and
    # the CRF decode/loss paths of NER are outside the forward hot path modeled here.

    key = jax.random.PRNGKey(0)
    key, xk = jax.random.split(key)
    x = jax.random.normal(xk, (B, S, bert_dim), jnp.float32)

    params = init_params(key, bert_dim, domain_clf_encode_dim,
                         domain_clf_num_layer, num_domains,
                         ner_d_hidden, ner_num_layers, ner_num_tags)

    # mode == 'source'
    task_pred, shared_inform, encoding = overall_model_forward(
        x, params, "source",
        n_enc_layers=domain_clf_num_layer, n_ner_layers=ner_num_layers)
    jax.block_until_ready((task_pred, shared_inform, encoding))

    # mode == 'target' (separate kernel: no NER compute / writeback)
    t2, s2, e2 = overall_model_forward(
        x, params, "target",
        n_enc_layers=domain_clf_num_layer, n_ner_layers=ner_num_layers)
    jax.block_until_ready((t2, s2))

    assert task_pred.shape == (B, num_domains)
    assert shared_inform.shape == (B, S, domain_clf_encode_dim)
    assert encoding.shape == (B, S, ner_num_tags)
    assert e2 is None

    # numeric check vs f32 reference (loose tolerance: bf16 matmul operands)
    rt, rs, re = _reference_forward(x, params, "source",
                                    domain_clf_num_layer, ner_num_layers)
    def _check(a, b, name):
        err = float(jnp.max(jnp.abs(a - b)))
        assert err < 3e-2, f"{name} mismatch: max abs err {err}"
    _check(task_pred, rt, "task_pred")
    _check(shared_inform, rs, "shared_inform")
    _check(encoding, re, "encoding")
    _check(t2, rt, "task_pred(target)")
    _check(s2, rs, "shared_inform(target)")

    assert bool(jnp.all(jnp.isfinite(task_pred)))
    assert bool(jnp.all(jnp.isfinite(shared_inform)))
    assert bool(jnp.all(jnp.isfinite(encoding)))

    print("KERNEL_OK")
</pallas_src>

<mosaic_0001>
module attributes {stable_mosaic.version = 11 : i64} {
  func.func @kernel(%arg0: i32, %arg1: memref<16x32xbf16, #tpu.memory_space<vmem>>, %arg2: memref<32x128xbf16, #tpu.memory_space<vmem>>, %arg3: memref<1x128xf32, #tpu.memory_space<vmem>>, %arg4: memref<128x128xbf16, #tpu.memory_space<vmem>>, %arg5: memref<1x128xf32, #tpu.memory_space<vmem>>, %arg6: memref<32x128xbf16, #tpu.memory_space<vmem>>, %arg7: memref<128x128xbf16, #tpu.memory_space<vmem>>, %arg8: memref<1x128xf32, #tpu.memory_space<vmem>>, %arg9: memref<128x128xbf16, #tpu.memory_space<vmem>>, %arg10: memref<1x128xf32, #tpu.memory_space<vmem>>, %arg11: memref<128x128xbf16, #tpu.memory_space<vmem>>, %arg12: memref<1x128xf32, #tpu.memory_space<vmem>>, %arg13: memref<16x128xf32, #tpu.memory_space<vmem>>, %arg14: memref<16x128xf32, #tpu.memory_space<vmem>>) attributes {dimension_semantics = [#tpu.dimension_semantics<parallel>], iteration_bounds = array<i64: 1>, scalar_prefetch = 0 : i64, scratch_operands = 0 : i64, tpu.core_type = #tpu.core_type<tc>, window_params = [{transform_indices = @transform_0, window_bounds = array<i64: 16, 32>}, {pipeline_mode = #tpu.pipeline_mode<synchronous>, transform_indices = @transform_1, window_bounds = array<i64: 32, 128>}, {pipeline_mode = #tpu.pipeline_mode<synchronous>, transform_indices = @transform_2, window_bounds = array<i64: 1, 128>}, {pipeline_mode = #tpu.pipeline_mode<synchronous>, transform_indices = @transform_3, window_bounds = array<i64: 128, 128>}, {pipeline_mode = #tpu.pipeline_mode<synchronous>, transform_indices = @transform_4, window_bounds = array<i64: 1, 128>}, {pipeline_mode = #tpu.pipeline_mode<synchronous>, transform_indices = @transform_5, window_bounds = array<i64: 32, 128>}, {pipeline_mode = #tpu.pipeline_mode<synchronous>, transform_indices = @transform_6, window_bounds = array<i64: 128, 128>}, {pipeline_mode = #tpu.pipeline_mode<synchronous>, transform_indices = @transform_7, window_bounds = array<i64: 1, 128>}, {pipeline_mode = #tpu.pipeline_mode<synchronous>, transform_indices = @transform_8, window_bounds = array<i64: 128, 128>}, {pipeline_mode = #tpu.pipeline_mode<synchronous>, transform_indices = @transform_9, window_bounds = array<i64: 1, 128>}, {pipeline_mode = #tpu.pipeline_mode<synchronous>, transform_indices = @transform_10, window_bounds = array<i64: 128, 128>}, {pipeline_mode = #tpu.pipeline_mode<synchronous>, transform_indices = @transform_11, window_bounds = array<i64: 1, 128>}, {transform_indices = @transform_12, window_bounds = array<i64: 16, 128>}, {transform_indices = @transform_13, window_bounds = array<i64: 16, 128>}]} {
    %c0 = arith.constant 0 : index
    %c0_0 = arith.constant 0 : index
    %0 = vector.load %arg1[%c0, %c0_0] : memref<16x32xbf16, #tpu.memory_space<vmem>>, vector<16x32xbf16>
    %c0_1 = arith.constant 0 : index
    %c0_2 = arith.constant 0 : index
    %1 = vector.load %arg2[%c0_1, %c0_2] : memref<32x128xbf16, #tpu.memory_space<vmem>>, vector<32x128xbf16>
    %cst = arith.constant dense<0.000000e+00> : vector<16x128xf32>
    %2 = tpu.matmul %0, %1, %cst {dimension_numbers = #tpu.dot_dimension_numbers<[1], [0], [0], [1], [0, 0, 1, 1], [], []>} : vector<16x32xbf16>, vector<32x128xbf16>, vector<16x128xf32> -> vector<16x128xf32>
    %c0_3 = arith.constant 0 : index
    %c0_4 = arith.constant 0 : index
    %3 = vector.load %arg3[%c0_3, %c0_4] : memref<1x128xf32, #tpu.memory_space<vmem>>, vector<1x128xf32>
    %4 = vector.broadcast %3 : vector<1x128xf32> to vector<16x128xf32>
    %5 = arith.addf %2, %4 : vector<16x128xf32>
    %6 = math.tanh %5 : vector<16x128xf32>
    %c0_5 = arith.constant 0 : index
    %c0_6 = arith.constant 0 : index
    %7 = vector.load %arg4[%c0_5, %c0_6] : memref<128x128xbf16, #tpu.memory_space<vmem>>, vector<128x128xbf16>
    %c0_7 = arith.constant 0 : index
    %c0_8 = arith.constant 0 : index
    %8 = vector.load %arg5[%c0_7, %c0_8] : memref<1x128xf32, #tpu.memory_space<vmem>>, vector<1x128xf32>
    %9 = arith.truncf %6 : vector<16x128xf32> to vector<16x128xbf16>
    %cst_9 = arith.constant dense<0.000000e+00> : vector<16x128xf32>
    %10 = tpu.matmul %9, %7, %cst_9 {dimension_numbers = #tpu.dot_dimension_numbers<[1], [0], [0], [1], [0, 0, 1, 1], [], []>} : vector<16x128xbf16>, vector<128x128xbf16>, vector<16x128xf32> -> vector<16x128xf32>
    %11 = vector.broadcast %8 : vector<1x128xf32> to vector<16x128xf32>
    %12 = arith.addf %10, %11 : vector<16x128xf32>
    %13 = math.tanh %12 : vector<16x128xf32>
    %c0_10 = arith.constant 0 : index
    %c0_11 = arith.constant 0 : index
    %14 = vector.load %arg13[%c0_10, %c0_11] : memref<16x128xf32, #tpu.memory_space<vmem>>, vector<16x128xf32>
    tpu.vector_store %arg13[%c0_10, %c0_11], %13 {strides = array<i32>} : memref<16x128xf32, #tpu.memory_space<vmem>>, vector<16x128xf32>,
    %c0_12 = arith.constant 0 : index
    %c0_13 = arith.constant 0 : index
    %15 = vector.load %arg6[%c0_12, %c0_13] : memref<32x128xbf16, #tpu.memory_space<vmem>>, vector<32x128xbf16>
    %cst_14 = arith.constant dense<0.000000e+00> : vector<16x128xf32>
    %16 = tpu.matmul %0, %15, %cst_14 {dimension_numbers = #tpu.dot_dimension_numbers<[1], [0], [0], [1], [0, 0, 1, 1], [], []>} : vector<16x32xbf16>, vector<32x128xbf16>, vector<16x128xf32> -> vector<16x128xf32>
    %17 = arith.truncf %13 : vector<16x128xf32> to vector<16x128xbf16>
    %c0_15 = arith.constant 0 : index
    %c0_16 = arith.constant 0 : index
    %18 = vector.load %arg7[%c0_15, %c0_16] : memref<128x128xbf16, #tpu.memory_space<vmem>>, vector<128x128xbf16>
    %cst_17 = arith.constant dense<0.000000e+00> : vector<16x128xf32>
    %19 = tpu.matmul %17, %18, %cst_17 {dimension_numbers = #tpu.dot_dimension_numbers<[1], [0], [0], [1], [0, 0, 1, 1], [], []>} : vector<16x128xbf16>, vector<128x128xbf16>, vector<16x128xf32> -> vector<16x128xf32>
    %20 = arith.addf %16, %19 : vector<16x128xf32>
    %c0_18 = arith.constant 0 : index
    %c0_19 = arith.constant 0 : index
    %21 = vector.load %arg8[%c0_18, %c0_19] : memref<1x128xf32, #tpu.memory_space<vmem>>, vector<1x128xf32>
    %22 = vector.broadcast %21 : vector<1x128xf32> to vector<16x128xf32>
    %23 = arith.addf %20, %22 : vector<16x128xf32>
    %cst_20 = arith.constant 0.000000e+00 : f32
    %24 = vector.broadcast %cst_20 : f32 to vector<16x128xf32>
    %25 = arith.maximumf %23, %24 : vector<16x128xf32>
    %c0_21 = arith.constant 0 : index
    %c0_22 = arith.constant 0 : index
    %26 = vector.load %arg9[%c0_21, %c0_22] : memref<128x128xbf16, #tpu.memory_space<vmem>>, vector<128x128xbf16>
    %c0_23 = arith.constant 0 : index
    %c0_24 = arith.constant 0 : index
    %27 = vector.load %arg10[%c0_23, %c0_24] : memref<1x128xf32, #tpu.memory_space<vmem>>, vector<1x128xf32>
    %28 = arith.truncf %25 : vector<16x128xf32> to vector<16x128xbf16>
    %cst_25 = arith.constant dense<0.000000e+00> : vector<16x128xf32>
    %29 = tpu.matmul %28, %26, %cst_25 {dimension_numbers = #tpu.dot_dimension_numbers<[1], [0], [0], [1], [0, 0, 1, 1], [], []>} : vector<16x128xbf16>, vector<128x128xbf16>, vector<16x128xf32> -> vector<16x128xf32>
    %30 = vector.broadcast %27 : vector<1x128xf32> to vector<16x128xf32>
    %31 = arith.addf %29, %30 : vector<16x128xf32>
    %cst_26 = arith.constant 0.000000e+00 : f32
    %32 = vector.broadcast %cst_26 : f32 to vector<16x128xf32>
    %33 = arith.maximumf %31, %32 : vector<16x128xf32>
    %34 = arith.truncf %33 : vector<16x128xf32> to vector<16x128xbf16>
    %c0_27 = arith.constant 0 : index
    %c0_28 = arith.constant 0 : index
    %35 = vector.load %arg11[%c0_27, %c0_28] : memref<128x128xbf16, #tpu.memory_space<vmem>>, vector<128x128xbf16>
    %cst_29 = arith.constant dense<0.000000e+00> : vector<16x128xf32>
    %36 = tpu.matmul %34, %35, %cst_29 {dimension_numbers = #tpu.dot_dimension_numbers<[1], [0], [0], [1], [0, 0, 1, 1], [], []>} : vector<16x128xbf16>, vector<128x128xbf16>, vector<16x128xf32> -> vector<16x128xf32>
    %c0_30 = arith.constant 0 : index
    %c0_31 = arith.constant 0 : index
    %37 = vector.load %arg12[%c0_30, %c0_31] : memref<1x128xf32, #tpu.memory_space<vmem>>, vector<1x128xf32>
    %38 = vector.broadcast %37 : vector<1x128xf32> to vector<16x128xf32>
    %39 = arith.addf %36, %38 : vector<16x128xf32>
    %c0_32 = arith.constant 0 : index
    %c0_33 = arith.constant 0 : index
    %40 = vector.load %arg14[%c0_32, %c0_33] : memref<16x128xf32, #tpu.memory_space<vmem>>, vector<16x128xf32>
    tpu.vector_store %arg14[%c0_32, %c0_33], %39 {strides = array<i32>} : memref<16x128xf32, #tpu.memory_space<vmem>>, vector<16x128xf32>,
    return
  }
  func.func @transform_0(%arg0: i32) -> (i32, i32) {
    %c0_i32 = arith.constant 0 : i32
    %c0_i32_0 = arith.constant 0 : i32
    return %arg0, %c0_i32 : i32, i32
  }
  func.func @transform_1(%arg0: i32) -> (i32, i32) {
    %c0_i32 = arith.constant 0 : i32
    %c0_i32_0 = arith.constant 0 : i32
    %c0_i32_1 = arith.constant 0 : i32
    return %c0_i32, %c0_i32_0 : i32, i32
  }
  func.func @transform_2(%arg0: i32) -> (i32, i32) {
    %c0_i32 = arith.constant 0 : i32
    %c0_i32_0 = arith.constant 0 : i32
    %c0_i32_1 = arith.constant 0 : i32
    return %c0_i32, %c0_i32_0 : i32, i32
  }
  func.func @transform_3(%arg0: i32) -> (i32, i32) {
    %c0_i32 = arith.constant 0 : i32
    %c0_i32_0 = arith.constant 0 : i32
    %c0_i32_1 = arith.constant 0 : i32
    return %c0_i32, %c0_i32_0 : i32, i32
  }
  func.func @transform_4(%arg0: i32) -> (i32, i32) {
    %c0_i32 = arith.constant 0 : i32
    %c0_i32_0 = arith.constant 0 : i32
    %c0_i32_1 = arith.constant 0 : i32
    return %c0_i32, %c0_i32_0 : i32, i32
  }
  func.func @transform_5(%arg0: i32) -> (i32, i32) {
    %c0_i32 = arith.constant 0 : i32
    %c0_i32_0 = arith.constant 0 : i32
    %c0_i32_1 = arith.constant 0 : i32
    return %c0_i32, %c0_i32_0 : i32, i32
  }
  func.func @transform_6(%arg0: i32) -> (i32, i32) {
    %c0_i32 = arith.constant 0 : i32
    %c0_i32_0 = arith.constant 0 : i32
    %c0_i32_1 = arith.constant 0 : i32
    return %c0_i32, %c0_i32_0 : i32, i32
  }
  func.func @transform_7(%arg0: i32) -> (i32, i32) {
    %c0_i32 = arith.constant 0 : i32
    %c0_i32_0 = arith.constant 0 : i32
    %c0_i32_1 = arith.constant 0 : i32
    return %c0_i32, %c0_i32_0 : i32, i32
  }
  func.func @transform_8(%arg0: i32) -> (i32, i32) {
    %c0_i32 = arith.constant 0 : i32
    %c0_i32_0 = arith.constant 0 : i32
    %c0_i32_1 = arith.constant 0 : i32
    return %c0_i32, %c0_i32_0 : i32, i32
  }
  func.func @transform_9(%arg0: i32) -> (i32, i32) {
    %c0_i32 = arith.constant 0 : i32
    %c0_i32_0 = arith.constant 0 : i32
    %c0_i32_1 = arith.constant 0 : i32
    return %c0_i32, %c0_i32_0 : i32, i32
  }
  func.func @transform_10(%arg0: i32) -> (i32, i32) {
    %c0_i32 = arith.constant 0 : i32
    %c0_i32_0 = arith.constant 0 : i32
    %c0_i32_1 = arith.constant 0 : i32
    return %c0_i32, %c0_i32_0 : i32, i32
  }
  func.func @transform_11(%arg0: i32) -> (i32, i32) {
    %c0_i32 = arith.constant 0 : i32
    %c0_i32_0 = arith.constant 0 : i32
    %c0_i32_1 = arith.constant 0 : i32
    return %c0_i32, %c0_i32_0 : i32, i32
  }
  func.func @transform_12(%arg0: i32) -> (i32, i32) {
    %c0_i32 = arith.constant 0 : i32
    %c0_i32_0 = arith.constant 0 : i32
    return %arg0, %c0_i32 : i32, i32
  }
  func.func @transform_13(%arg0: i32) -> (i32, i32) {
    %c0_i32 = arith.constant 0 : i32
    %c0_i32_0 = arith.constant 0 : i32
    return %arg0, %c0_i32 : i32, i32
  }
}

</mosaic_0001>

<bundles_post_ra>
// kernel: _overall_forward_core.1
= control target key start
LH: loop header
LB: loop body
LE: loop exit
PB: predicated region body
PF: predicated region fallthrough
CT: control target
= control target key end

     0   :  { %v879_v0 = vmov 0.0   ;;  %vm880_vm0 = vmmov 0   ;;  %vm74_vm1 = vcmask 261120   ;;  %s1143_s1 = inlined_call_operand.vmem [shape: bf16[32,128], index: 1, kind: input, shape index: {}]   ;;  %s1144_s3 = inlined_call_operand.vmem [shape: bf16[128,128], index: 3, kind: input, shape index: {}]   ;;  %s1145_s0 = inlined_call_operand.vmem [shape: bf16[16,32], index: 0, kind: input, shape index: {}]   ;;  %s1146_s6 = inlined_call_operand.vmem [shape: bf16[128,128], index: 6, kind: input, shape index: {}]   ;;  %s1147_s2 = inlined_call_operand.vmem [shape: f32[1,128], index: 2, kind: input, shape index: {}]   ;;  %s1148_s5 = inlined_call_operand.vmem [shape: bf16[32,128], index: 5, kind: input, shape index: {}]   ;;  %s1149_s8 = inlined_call_operand.vmem [shape: bf16[128,128], index: 8, kind: input, shape index: {}]   ;;  %s1150_s4 = inlined_call_operand.vmem [shape: f32[1,128], index: 4, kind: input, shape index: {}]   ;;  %s1151_s12 = inlined_call_operand.vmem [shape: f32[16,128], index: 12, kind: output, shape index: {0}]   ;;  %s1152_s10 = inlined_call_operand.vmem [shape: bf16[128,128], index: 10, kind: input, shape index: {}]   ;;  %s1153_s7 = inlined_call_operand.vmem [shape: f32[1,128], index: 7, kind: input, shape index: {}]   ;;  %s1154_s9 = inlined_call_operand.vmem [shape: f32[1,128], index: 9, kind: input, shape index: {}]   ;;  %s1155_s11 = inlined_call_operand.vmem [shape: f32[1,128], index: 11, kind: input, shape index: {}]   ;;  %s1156_s13 = inlined_call_operand.vmem [shape: f32[16,128], index: 13, kind: output, shape index: {1}]  }
   0x1   :  { %736 = vmatprep.subr.bf16.mxu0 %v879_v0  ;;  %v834_v1 = vld [vmem:[%s1143_s1] sm:$0xff]   ;;  %740 = vmatprep.mubr.msk.bf16.mxu0 %vm880_vm0, %v879_v0  ;;  %v835_v2 = vld [vmem:[%s1143_s1 + $0x8] sm:$0xff]   ;;  %v839_v6 = vld [vmem:[%s1144_s3 + $0x10] sm:$0xff]  }
   0x2   :  { %744 = vmatprep.subr.bf16.mxu1 %v879_v0  ;;  %760 = vmatprep.mubr.msk.bf16.mxu1 %vm880_vm0, %v879_v0  ;;  %v837_v3 = vld [vmem:[%s1144_s3] sm:$0xff]   ;;  %v838_v5 = vld [vmem:[%s1144_s3 + $0x8] sm:$0xff]   ;;  %v840_v7 = vld [vmem:[%s1144_s3 + $0x18] sm:$0xff]  }
   0x3   :  { %737 = vmatpush3.bf16.msra.mxu0 %v834_v1  ;;  %v970_v4 = vld [vmem:[%s1145_s0] sm:$0xff]   ;;  %745 = vmatpush3.bf16.msra.mxu1 %v837_v3  ;;  %v842_v9 = vld [vmem:[%s1144_s3 + $0x28] sm:$0xff]   ;;  %v843_v10 = vld [vmem:[%s1144_s3 + $0x30] sm:$0xff]  }
   0x4   :  { %738 = vmatprep.subr.bf16.mxu0 %v879_v0  ;;  %746 = vmatprep.subr.bf16.mxu1 %v879_v0  ;;  %v841_v8 = vld [vmem:[%s1144_s3 + $0x20] sm:$0xff]   ;;  %v844_v11 = vld [vmem:[%s1144_s3 + $0x38] sm:$0xff]   ;;  %v846_v13 = vld [vmem:[%s1146_s6 + $0x8] sm:$0xff]  }
   0x5   :  { %v845_v12 = vld [vmem:[%s1146_s6] sm:$0xff]   ;;  %v847_v14 = vld [vmem:[%s1146_s6 + $0x10] sm:$0xff]   ;;  %v848_v15 = vld [vmem:[%s1146_s6 + $0x18] sm:$0xff]  }
   0x6   :  { %v650_v16 = vld [vmem:[%s1147_s2] ss:$0 sm:$0xff]  ;;  %v850_v27 = vld [vmem:[%s1146_s6 + $0x28] sm:$0xff]   ;;  %v852_v29 = vld [vmem:[%s1146_s6 + $0x30] sm:$0xff]  }
   0x7   :  { %739 = vmatpush3.bf16.msra.mxu0 %v835_v2  ;;  %747 = vmatpush3.bf16.msra.mxu1 %v838_v5  ;;  %v849_v26 = vld [vmem:[%s1146_s6 + $0x20] sm:$0xff]   ;;  %v853_v30 = vld [vmem:[%s1148_s5 + $0x8] sm:$0xff]   ;;  %v854_v31 = vld [vmem:[%s1146_s6 + $0x38] sm:$0xff]  }
   0x8   :  { %764 = vmatprep.subr.bf16.mxu0 %v879_v0  ;;  %748 = vmatprep.subr.bf16.mxu1 %v879_v0  ;;  %v851_v28 = vld [vmem:[%s1148_s5] sm:$0xff]   ;;  %v856_v43 = vld [vmem:[%s1149_s8 + $0x8] sm:$0xff]   ;;  %v857_v44 = vld [vmem:[%s1149_s8 + $0x10] sm:$0xff]  }
   0x9   :  { %v655_v32 = vld [vmem:[%s1150_s4] ss:$0 sm:$0xff]  ;;  %v858_v45 = vld [vmem:[%s1149_s8 + $0x18] sm:$0xff]   ;;  %v860_v49 = vld [vmem:[%s1149_s8 + $0x28] sm:$0xff]  }
   0xa   :  { %741 = vmatmul.mubr.msk.bf16.vlgmr.msra.gmra.mrb[0].mxu0 %vm74_vm1, %v970_v4  ;;  %v855_v41 = vld [vmem:[%s1149_s8] sm:$0xff]   ;;  %v861_v52 = vld [vmem:[%s1149_s8 + $0x30] sm:$0xff]   ;;  %v862_v53 = vld [vmem:[%s1149_s8 + $0x38] sm:$0xff]  }
   0xb   :  { %780 = vmatprep.mubr.msk.bf16.mxu0 %vm880_vm0, %v879_v0  ;;  %749 = vmatpush3.bf16.msra.mxu1 %v839_v6  ;;  %v859_v46 = vld [vmem:[%s1149_s8 + $0x20] sm:$0xff]   ;;  %v864_v55 = vld [vmem:[%s1152_s10 + $0x8] sm:$0xff]   ;;  %v865_v56 = vld [vmem:[%s1152_s10 + $0x10] sm:$0xff]  }
   0xc   :  { %750 = vmatprep.subr.bf16.mxu1 %v879_v0  ;;  %765 = vmatpush3.bf16.msra.mxu0 %v845_v12  ;;  %v863_v54 = vld [vmem:[%s1152_s10] sm:$0xff]   ;;  %v866_v57 = vld [vmem:[%s1152_s10 + $0x18] sm:$0xff]   ;;  %v868_v59 = vld [vmem:[%s1152_s10 + $0x28] sm:$0xff]  }
   0xd   :  { %766 = vmatprep.subr.bf16.mxu0 %v879_v0  ;;  %v867_v58 = vld [vmem:[%s1152_s10 + $0x20] sm:$0xff]  }
   0xe   :  { %v675_v61 = vld [vmem:[%s1153_s7] ss:$0 sm:$0xff] }
   0xf   :  { %751 = vmatpush3.bf16.msra.mxu1 %v840_v7 }
  0x10   :  { %752 = vmatprep.subr.bf16.mxu1 %v879_v0  ;;  %767 = vmatpush3.bf16.msra.mxu0 %v846_v13 }
  0x11   :  { %768 = vmatprep.subr.bf16.mxu0 %v879_v0 }
  0x13   :  { %753 = vmatpush3.bf16.msra.mxu1 %v841_v8 }
  0x14   :  { %754 = vmatprep.subr.bf16.mxu1 %v879_v0  ;;  %769 = vmatpush3.bf16.msra.mxu0 %v847_v14 }
  0x15   :  { %770 = vmatprep.subr.bf16.mxu0 %v879_v0 }
  0x17   :  { %755 = vmatpush3.bf16.msra.mxu1 %v842_v9  ;;  %v869_v9 = vld [vmem:[%s1152_s10 + $0x30] sm:$0xff]  }
  0x18   :  { %756 = vmatprep.subr.bf16.mxu1 %v879_v0  ;;  %771 = vmatpush3.bf16.msra.mxu0 %v848_v15 }
  0x19   :  { %772 = vmatprep.subr.bf16.mxu0 %v879_v0 }
  0x1b   :  { %757 = vmatpush3.bf16.msra.mxu1 %v843_v10  ;;  %v870_v10 = vld [vmem:[%s1152_s10 + $0x38] sm:$0xff]  }
  0x1c   :  { %758 = vmatprep.subr.bf16.mxu1 %v879_v0  ;;  %773 = vmatpush3.bf16.msra.mxu0 %v849_v26 }
  0x1d   :  { %774 = vmatprep.subr.bf16.mxu0 %v879_v0 }
  0x1f   :  { %759 = vmatpush3.bf16.msra.mxu1 %v844_v11  ;;  %v676_v11 = vld [vmem:[%s1154_s9] ss:$0 sm:$0xff] }
  0x20   :  { %784 = vmatprep.subr.bf16.mxu1 %v879_v0  ;;  %775 = vmatpush3.bf16.msra.mxu0 %v850_v27 }
  0x21   :  { %776 = vmatprep.subr.bf16.mxu0 %v879_v0 }
  0x24   :  { %777 = vmatpush3.bf16.msra.mxu0 %v852_v29 }
  0x25   :  { %778 = vmatprep.subr.bf16.mxu0 %v879_v0 }
  0x28   :  { %779 = vmatpush3.bf16.msra.mxu0 %v854_v31 }
  0x29   :  { %792 = vmatprep.subr.bf16.mxu0 %v879_v0 }
  0xdd   :  { %v112_v17 = vpop.f32.mrb[0].mxu0 }
  0xde   :  { %v113_v18 = vadd.f32 %v650_v16, %v112_v17  ;;  %v742_v19 = vpop.f32.mrb[1].mxu0 }
  0xdf   :  { %v115_v20 = vpop.f32.mrb[2].mxu0 }
  0xe0   :  { %v116_v21 = vadd.f32 %v650_v16, %v115_v20  ;;  %v743_v22 = vpop.f32.mrb[3].mxu0  ;;  %871 = vtanh.f32 %v113_v18 }
  0xe2   :  { %873 = vtanh.f32 %v116_v21 }
  0xea   :  { %v872_v23 = vpop.eup %871 }
  0xec   :  { %v874_v24 = vpop.eup %873 }
  0xed   :  { %v138_v25 = vpack.c.bf16 %v874_v24, %v872_v23 }
  0xef   :  { %761 = vmatmul.mubr.bf16.vlgmr.msra.gmra.mrb[0].mxu1 %v138_v25 }
  0xf0   :  { %788 = vmatprep.mubr.msk.bf16.mxu1 %vm880_vm0, %v879_v0  ;;  %785 = vmatpush3.bf16.msra.mxu1 %v851_v28 }
  0xf1   :  { %786 = vmatprep.subr.bf16.mxu1 %v879_v0 }
  0xf4   :  { %787 = vmatpush3.bf16.msra.mxu1 %v853_v30 }
  0xf5   :  { %812 = vmatprep.subr.bf16.mxu1 %v879_v0 }
  0xf7   :  { %789 = vmatmul.mubr.msk.bf16.vlgmr.msra.gmra.mrb[4].mxu1 %vm74_vm1, %v970_v4 }
  0xf8   :  { %828 = vmatprep.mubr.msk.bf16.mxu1 %vm880_vm0, %v879_v0  ;;  %813 = vmatpush3.bf16.msra.mxu1 %v863_v54 }
  0xf9   :  { %814 = vmatprep.subr.bf16.mxu1 %v879_v0 }
  0xfc   :  { %815 = vmatpush3.bf16.msra.mxu1 %v864_v55 }
  0xfd   :  { %816 = vmatprep.subr.bf16.mxu1 %v879_v0 }
 0x100   :  { %817 = vmatpush3.bf16.msra.mxu1 %v865_v56 }
 0x101   :  { %818 = vmatprep.subr.bf16.mxu1 %v879_v0 }
 0x104   :  { %819 = vmatpush3.bf16.msra.mxu1 %v866_v57 }
 0x105   :  { %820 = vmatprep.subr.bf16.mxu1 %v879_v0 }
 0x108   :  { %821 = vmatpush3.bf16.msra.mxu1 %v867_v58 }
 0x109   :  { %822 = vmatprep.subr.bf16.mxu1 %v879_v0 }
 0x10c   :  { %823 = vmatpush3.bf16.msra.mxu1 %v868_v59 }
 0x10d   :  { %824 = vmatprep.subr.bf16.mxu1 %v879_v0 }
 0x110   :  { %825 = vmatpush3.bf16.msra.mxu1 %v869_v9 }
 0x111   :  { %826 = vmatprep.subr.bf16.mxu1 %v879_v0 }
 0x114   :  { %827 = vmatpush3.bf16.msra.mxu1 %v870_v10 }
 0x1c2   :  { %v227_v33 = vpop.f32.mrb[0].mxu1 }
 0x1c3   :  { %v228_v34 = vadd.f32 %v655_v32, %v227_v33  ;;  %v762_v35 = vpop.f32.mrb[1].mxu1 }
 0x1c4   :  { %v230_v36 = vpop.f32.mrb[2].mxu1 }
 0x1c5   :  { %875 = vtanh.f32 %v228_v34  ;;  %v231_v37 = vadd.f32 %v655_v32, %v230_v36  ;;  %v763_v38 = vpop.f32.mrb[3].mxu1 }
 0x1c7   :  { %877 = vtanh.f32 %v231_v37 }
 0x1ca   :  { %v394_v47 = vpop.f32.mrb[4].mxu1 }
 0x1cb   :  { %v790_v48 = vpop.f32.mrb[5].mxu1 }
 0x1cc   :  { %v397_v50 = vpop.f32.mrb[6].mxu1 }
 0x1cd   :  { %v791_v51 = vpop.f32.mrb[7].mxu1 }
 0x1cf   :  { %v876_v39 = vpop.eup %875 }
 0x1d0   :  { %236 = vst [vmem:[%s1151_s12] sm:$0xff] %v876_v39 }
 0x1d1   :  { %v878_v40 = vpop.eup %877 }
 0x1d2   :  { %237 = vst [vmem:[%s1151_s12 + $0x8] sm:$0xff] %v878_v40  ;;  %v242_v42 = vpack.c.bf16 %v878_v40, %v876_v39 }
 0x1d4   :  { %781 = vmatmul.mubr.bf16.vlgmr.msra.gmra.mrb[4].mxu0 %v242_v42 }
 0x1d5   :  { %793 = vmatpush3.bf16.msra.mxu0 %v855_v41  ;;  %808 = vmatprep.mubr.msk.bf16.mxu0 %vm880_vm0, %v879_v0 }
 0x1d6   :  { %794 = vmatprep.subr.bf16.mxu0 %v879_v0 }
 0x1d9   :  { %795 = vmatpush3.bf16.msra.mxu0 %v856_v43 }
 0x1da   :  { %796 = vmatprep.subr.bf16.mxu0 %v879_v0 }
 0x1dd   :  { %797 = vmatpush3.bf16.msra.mxu0 %v857_v44 }
 0x1de   :  { %798 = vmatprep.subr.bf16.mxu0 %v879_v0 }
 0x1e1   :  { %799 = vmatpush3.bf16.msra.mxu0 %v858_v45 }
 0x1e2   :  { %800 = vmatprep.subr.bf16.mxu0 %v879_v0 }
 0x1e5   :  { %801 = vmatpush3.bf16.msra.mxu0 %v859_v46 }
 0x1e6   :  { %802 = vmatprep.subr.bf16.mxu0 %v879_v0 }
 0x1e9   :  { %803 = vmatpush3.bf16.msra.mxu0 %v860_v49 }
 0x1ea   :  { %804 = vmatprep.subr.bf16.mxu0 %v879_v0 }
 0x1ed   :  { %805 = vmatpush3.bf16.msra.mxu0 %v861_v52 }
 0x1ee   :  { %806 = vmatprep.subr.bf16.mxu0 %v879_v0  ;;  %v685_v0 = vld [vmem:[%s1155_s11] ss:$0 sm:$0xff] }
 0x1f1   :  { %807 = vmatpush3.bf16.msra.mxu0 %v862_v53 }
 0x2a7   :  { %v341_v60 = vpop.f32.mrb[4].mxu0 }
 0x2a8   :  { %v395_v62 = vadd.f32 %v394_v47, %v341_v60  ;;  %v782_v63 = vpop.f32.mrb[5].mxu0 }
 0x2a9   :  { %v344_v1 = vpop.f32.mrb[6].mxu0 }
 0x2aa   :  { %v408_v2 = vadd.f32 %v675_v61, %v395_v62  ;;  %v398_v3 = vadd.f32 %v397_v50, %v344_v1  ;;  %v783_v4 = vpop.f32.mrb[7].mxu0 }
 0x2ac   :  { %v409_v5 = vadd.f32 %v675_v61, %v398_v3  ;;  %v410_v6 = vmax.f32 %v408_v2, 0.0 }
 0x2ae   :  { %v411_v7 = vmax.f32 %v409_v5, 0.0 }
 0x2b0   :  { %v429_v8 = vpack.c.bf16 %v411_v7, %v410_v6 }
 0x2b2   :  { %809 = vmatmul.mubr.bf16.vlgmr.msra.gmra.mrb[8].mxu0 %v429_v8 }
 0x385   :  { %v518_v12 = vpop.f32.mrb[8].mxu0 }
 0x386   :  { %v519_v13 = vadd.f32 %v676_v11, %v518_v12  ;;  %v810_v14 = vpop.f32.mrb[9].mxu0 }
 0x387   :  { %v521_v15 = vpop.f32.mrb[10].mxu0 }
 0x388   :  { %v522_v16 = vadd.f32 %v676_v11, %v521_v15  ;;  %v811_v17 = vpop.f32.mrb[11].mxu0  ;;  %v525_v18 = vmax.f32 %v519_v13, 0.0 }
 0x38a   :  { %v526_v19 = vmax.f32 %v522_v16, 0.0 }
 0x38c   :  { %v527_v20 = vpack.c.bf16 %v526_v19, %v525_v18 }
 0x38e   :  { %829 = vmatmul.mubr.bf16.vlgmr.msra.gmra.mrb[8].mxu1 %v527_v20 }
 0x461   :  { %v633_v21 = vpop.f32.mrb[8].mxu1 }
 0x462   :  { %v634_v22 = vadd.f32 %v685_v0, %v633_v21  ;;  %v830_v23 = vpop.f32.mrb[9].mxu1 }
 0x463   :  { %v636_v24 = vpop.f32.mrb[10].mxu1 }
 0x464   :  { %640 = vst [vmem:[%s1156_s13] sm:$0xff] %v634_v22  ;;  %v637_v25 = vadd.f32 %v685_v0, %v636_v24  ;;  %v831_v26 = vpop.f32.mrb[11].mxu1 }
 0x466   :  { %641 = vst [vmem:[%s1156_s13 + $0x8] sm:$0xff] %v637_v25 }

</bundles_post_ra>
